<compile_context>
chip_gen: v7x
topology: tpu7x:2x2x1
jax: 0.10.0
libtpu: 0.0.40
codegen_flags: <defaults>
</compile_context>

<pallas_src>
import jax
import jax.numpy as jnp
from jax import lax
from jax.experimental import pallas as pl
from jax.experimental.pallas import tpu as pltpu

BN_EPS = 1e-5
IN_FEATURES = 784
HID_PAD = 128          # fc1 out (32) padded to one full lane vreg
OUT_PAD = 128          # fc2 out (10) padded to one full lane vreg
NUM_HIDDEN = 32
NUM_CLASSES = 10
NEG_FILL = -1e30       # baked-in log-softmax mask for padded class lanes


def bnn_mnist_kernel(x_ref, w1_ref, g1_ref, be1_ref, w2_ref, g2_ref, be2_ref,
                     o_hbm, z1_ref, sum1_ref, sumsq1_ref, out_vmem, out_sem):
    i = pl.program_id(0)
    tb = x_ref.shape[0]                # static batch-tile size
    batch = z1_ref.shape[0]            # static total batch
    chunk = out_vmem.shape[1]          # static epilogue chunk size
    nchunks = batch // chunk           # static

    @pl.when(i == 0)
    def _():
        sum1_ref[...] = jnp.zeros_like(sum1_ref)
        sumsq1_ref[...] = jnp.zeros_like(sumsq1_ref)

    # ---- fc1 on this batch tile: bf16 MXU matmul, f32 accumulate.
    #      (Linear bias omitted: it cancels under training-mode BatchNorm.)
    z1_tile = jnp.dot(x_ref[...], w1_ref[...],
                      preferred_element_type=jnp.float32)          # (tb, 128) f32

    # BN1 statistics accumulated per tile; this VPU work hides under the x DMA.
    sum1_ref[...] += jnp.sum(z1_tile, axis=0, keepdims=True)
    sumsq1_ref[...] += jnp.sum(z1_tile * z1_tile, axis=0, keepdims=True)

    row = pl.multiple_of(i * tb, tb)
    z1_ref[pl.ds(row, tb), :] = z1_tile.astype(jnp.bfloat16)

    # ---- last tile: BN1 -> binarize -> fc2 -> BN2 -> log-softmax (chunked).
    @pl.when(i == pl.num_programs(0) - 1)
    def _():
        inv_b = 1.0 / float(batch)
        mu1 = sum1_ref[...] * inv_b
        var1 = jnp.maximum(sumsq1_ref[...] * inv_b - mu1 * mu1, 0.0)
        scale1 = g1_ref[...] * lax.rsqrt(var1 + BN_EPS)
        shift1 = be1_ref[...] - mu1 * scale1
        w2 = w2_ref[...]

        def z2_chunk(c):
            r = pl.multiple_of(c * chunk, chunk)
            z1c = z1_ref[pl.ds(r, chunk), :].astype(jnp.float32)
            z1n = z1c * scale1 + shift1
            # Hardtanh followed by binarization == binarization (clip keeps sign).
            # Padded hidden lanes binarize to +/-1 but w2's padded rows are zero,
            # so they contribute nothing to z2 (must stay zero in prepare_params).
            hb = jnp.where(z1n >= 0.0, 1.0, -1.0).astype(jnp.bfloat16)
            return jnp.dot(hb, w2, preferred_element_type=jnp.float32)

        # Pass 1: full-batch BN2 statistics (fc2 recompute per chunk is cheap).
        def stats_body(c, carry):
            s2, ss2 = carry
            z2 = z2_chunk(c)
            return (s2 + jnp.sum(z2, axis=0, keepdims=True),
                    ss2 + jnp.sum(z2 * z2, axis=0, keepdims=True))

        s2, ss2 = lax.fori_loop(
            0, nchunks, stats_body,
            (jnp.zeros((1, OUT_PAD), jnp.float32),
             jnp.zeros((1, OUT_PAD), jnp.float32)))

        mu2 = s2 * inv_b
        var2 = jnp.maximum(ss2 * inv_b - mu2 * mu2, 0.0)
        # Padded class lanes: g2 == 0 and be2 == -1e30 bake the softmax mask
        # into the BN2 affine (no iota/select needed in the hot epilogue).
        scale2 = g2_ref[...] * lax.rsqrt(var2 + BN_EPS)
        shift2 = be2_ref[...] - mu2 * scale2

        # Pass 2: normalize + log-softmax, stream output chunks to HBM
        # (double-buffered manual DMA so writeback overlaps softmax compute).
        def out_body(c, carry):
            slot = c & 1
            r = pl.multiple_of(c * chunk, chunk)

            @pl.when(c >= 2)
            def _():
                pltpu.make_async_copy(out_vmem.at[slot],
                                      o_hbm.at[pl.ds(r, chunk)],
                                      out_sem.at[slot]).wait()

            z2n = z2_chunk(c) * scale2 + shift2
            m = jnp.max(z2n, axis=-1, keepdims=True)
            s = z2n - m
            lse = jnp.log(jnp.sum(jnp.exp(s), axis=-1, keepdims=True))
            out_vmem[slot] = s - lse
            pltpu.make_async_copy(out_vmem.at[slot],
                                  o_hbm.at[pl.ds(r, chunk)],
                                  out_sem.at[slot]).start()
            return carry

        lax.fori_loop(0, nchunks, out_body, 0)

        # Drain outstanding output copies before the kernel ends.
        for slot in range(min(nchunks, 2)):
            pltpu.make_async_copy(out_vmem.at[slot],
                                  o_hbm.at[pl.ds(0, chunk)],
                                  out_sem.at[slot]).wait()


def _largest_divisor(n, cap, align):
    for d in range(min(cap, n), 0, -1):
        if n % d == 0 and d % align == 0:
            return d
    return 0


def _pick_batch_tile(batch):
    for align in (16, 8):
        t = _largest_divisor(batch, 2048, align)
        if t:
            return t
    return batch


def _pick_epilogue_chunk(batch):
    t = _largest_divisor(batch, 1024, 8)
    return t if t else batch


def bnn_mnist_forward(x_nchw, params):
    batch = x_nchw.shape[0]
    # TODO(synk): ideally the loader supplies bf16 (or int8 on v5e/v6e) so this
    # cast does not cost an extra HBM pass over x.
    x = x_nchw.reshape(batch, -1).astype(jnp.bfloat16)       # (B, 784), unpadded

    tb = _pick_batch_tile(batch)
    chunk = _pick_epilogue_chunk(batch)
    grid = (batch // tb,)

    def full2(shape):
        return pl.BlockSpec(shape, lambda i: (0, 0))

    # VMEM budget: derived from actual resident buffers, clamped to the chip.
    est = (batch * HID_PAD * 2                 # resident z1 (bf16)
           + 2 * tb * IN_FEATURES * 2          # double-buffered x tiles
           + 2 * IN_FEATURES * HID_PAD * 2     # w1
           + 2 * HID_PAD * OUT_PAD * 2         # w2
           + 2 * chunk * OUT_PAD * 4           # output staging buffers
           + 8 * chunk * OUT_PAD * 4           # epilogue temporaries headroom
           + chunk * HID_PAD * 4)
    try:
        vmem_cap = int(pltpu.get_tpu_info().vmem_capacity_bytes)
    except Exception:
        vmem_cap = 64 * 1024 * 1024            # conservative (v7x per-TC)
    vmem_limit = int(min(max(2 * est, 32 * 1024 * 1024), 0.85 * vmem_cap))

    out_padded = pl.pallas_call(
        bnn_mnist_kernel,
        out_shape=jax.ShapeDtypeStruct((batch, OUT_PAD), jnp.float32),
        grid_spec=pltpu.PrefetchScalarGridSpec(
            num_scalar_prefetch=0,
            grid=grid,
            in_specs=[
                pl.BlockSpec((tb, IN_FEATURES), lambda i: (i, 0)),  # streamed x
                full2((IN_FEATURES, HID_PAD)),                      # w1 (+-1 bf16)
                full2((1, HID_PAD)), full2((1, HID_PAD)),           # bn1 g / b
                full2((HID_PAD, OUT_PAD)),                          # w2 (+-1 bf16)
                full2((1, OUT_PAD)), full2((1, OUT_PAD)),           # bn2 g / b
            ],
            out_specs=pl.BlockSpec(memory_space=pl.ANY),   # written via manual DMA
            scratch_shapes=[
                pltpu.VMEM((batch, HID_PAD), jnp.bfloat16),    # resident z1
                pltpu.VMEM((1, HID_PAD), jnp.float32),         # sum(z1)
                pltpu.VMEM((1, HID_PAD), jnp.float32),         # sum(z1^2)
                pltpu.VMEM((2, chunk, OUT_PAD), jnp.float32),  # out staging
                pltpu.SemaphoreType.DMA((2,)),                 # out DMA sems
            ],
        ),
        compiler_params=pltpu.CompilerParams(
            dimension_semantics=("arbitrary",),
            vmem_limit_bytes=vmem_limit,
        ),
    )(x, params["w1b"], params["g1"], params["be1"],
      params["w2b"], params["g2"], params["be2"])
    return out_padded[:, :NUM_CLASSES]


def prepare_params(w1, g1, be1, w2, g2, be2):
    """Pre-binarize weights (+/-1, bf16), transpose to (in, out) and zero-pad to
    lane-dense shapes.  w2's padded rows MUST stay zero (padded hidden lanes
    binarize to +/-1) and its padded output columns stay zero so z2 padded
    columns are exactly 0; the BN2 padding (gamma=0, beta=-1e30) then bakes the
    log-softmax class mask in for free."""
    def binarize(w):
        return jnp.where(w >= 0.0, 1.0, -1.0)

    w1b = jnp.zeros((IN_FEATURES, HID_PAD), jnp.float32)
    w1b = w1b.at[:, :NUM_HIDDEN].set(binarize(w1).T)
    w2b = jnp.zeros((HID_PAD, OUT_PAD), jnp.float32)
    w2b = w2b.at[:NUM_HIDDEN, :NUM_CLASSES].set(binarize(w2).T)

    def pad_vec(v, n, fill):
        out = jnp.full((1, n), fill, jnp.float32)
        return out.at[0, :v.shape[0]].set(v.astype(jnp.float32))

    return {
        "w1b": w1b.astype(jnp.bfloat16),
        "g1": pad_vec(g1, HID_PAD, 1.0),
        "be1": pad_vec(be1, HID_PAD, 0.0),
        "w2b": w2b.astype(jnp.bfloat16),
        "g2": pad_vec(g2, OUT_PAD, 0.0),
        "be2": pad_vec(be2, OUT_PAD, NEG_FILL),
    }


def init_params(key):
    # torch.nn.Linear weight layout is (out_features, in_features).
    # Linear biases are intentionally not created: they cancel exactly under
    # training-mode BatchNorm, so the forward output is identical without them.
    k = jax.random.split(key, 2)
    w1 = jax.random.normal(k[0], (NUM_HIDDEN, IN_FEATURES), jnp.float32) * 0.05
    w2 = jax.random.normal(k[1], (NUM_CLASSES, NUM_HIDDEN), jnp.float32) * 0.05
    g1 = jnp.ones((NUM_HIDDEN,), jnp.float32)     # BatchNorm1d default weight
    be1 = jnp.zeros((NUM_HIDDEN,), jnp.float32)   # BatchNorm1d default bias
    g2 = jnp.ones((NUM_CLASSES,), jnp.float32)
    be2 = jnp.zeros((NUM_CLASSES,), jnp.float32)
    return prepare_params(w1, g1, be1, w2, g2, be2)


if __name__ == "__main__":
    key = jax.random.PRNGKey(0)
    kx, kp = jax.random.split(key)
    x = jax.random.normal(kx, (8, 1, 28, 28), jnp.float32)   # MNIST-shaped batch
    params = init_params(kp)

    out = bnn_mnist_forward(x, params)
    out = jax.block_until_ready(out)

    assert out.shape == (8, 10)
    assert bool(jnp.all(jnp.isfinite(out)))
    # log-softmax rows should (numerically) sum to 1 after exp
    assert bool(jnp.allclose(jnp.sum(jnp.exp(out), axis=-1), 1.0, atol=1e-4))
    print("KERNEL_OK")
</pallas_src>

<mosaic_0001>
module attributes {stable_mosaic.version = 11 : i64} {
  func.func @bnn_mnist_kernel(%arg0: i32, %arg1: memref<8x784xbf16, #tpu.memory_space<vmem>>, %arg2: memref<784x128xbf16, #tpu.memory_space<vmem>>, %arg3: memref<1x128xf32, #tpu.memory_space<vmem>>, %arg4: memref<1x128xf32, #tpu.memory_space<vmem>>, %arg5: memref<128x128xbf16, #tpu.memory_space<vmem>>, %arg6: memref<1x128xf32, #tpu.memory_space<vmem>>, %arg7: memref<1x128xf32, #tpu.memory_space<vmem>>, %arg8: memref<8x128xf32, #tpu.memory_space<any>>, %arg9: memref<8x128xbf16, #tpu.memory_space<vmem>>, %arg10: memref<1x128xf32, #tpu.memory_space<vmem>>, %arg11: memref<1x128xf32, #tpu.memory_space<vmem>>, %arg12: memref<2x8x128xf32, #tpu.memory_space<vmem>>, %arg13: memref<2x!tpu.dma_semaphore, #tpu.memory_space<semaphore_mem>>) attributes {dimension_semantics = [#tpu.dimension_semantics<arbitrary>], iteration_bounds = array<i64: 1>, scalar_prefetch = 0 : i64, scratch_operands = 5 : i64, tpu.core_type = #tpu.core_type<tc>, window_params = [{transform_indices = @transform_0, window_bounds = array<i64: 8, 784>}, {pipeline_mode = #tpu.pipeline_mode<synchronous>, transform_indices = @transform_1, window_bounds = array<i64: 784, 128>}, {pipeline_mode = #tpu.pipeline_mode<synchronous>, transform_indices = @transform_2, window_bounds = array<i64: 1, 128>}, {pipeline_mode = #tpu.pipeline_mode<synchronous>, transform_indices = @transform_3, window_bounds = array<i64: 1, 128>}, {pipeline_mode = #tpu.pipeline_mode<synchronous>, transform_indices = @transform_4, window_bounds = array<i64: 128, 128>}, {pipeline_mode = #tpu.pipeline_mode<synchronous>, transform_indices = @transform_5, window_bounds = array<i64: 1, 128>}, {pipeline_mode = #tpu.pipeline_mode<synchronous>, transform_indices = @transform_6, window_bounds = array<i64: 1, 128>}, {}]} {
    %c0_i32 = arith.constant 0 : i32
    %0 = arith.cmpi eq, %arg0, %c0_i32 : i32
    %1 = arith.extui %0 : i1 to i32
    %c0_i32_0 = arith.constant 0 : i32
    %2 = arith.cmpi ne, %1, %c0_i32_0 : i32
    scf.if %2 {
      %cst_17 = arith.constant 0.000000e+00 : f32
      %25 = vector.broadcast %cst_17 : f32 to vector<1x128xf32>
      %c0_18 = arith.constant 0 : index
      %c0_19 = arith.constant 0 : index
      %26 = vector.load %arg10[%c0_18, %c0_19] : memref<1x128xf32, #tpu.memory_space<vmem>>, vector<1x128xf32>
      tpu.vector_store %arg10[%c0_18, %c0_19], %25 {strides = array<i32>} : memref<1x128xf32, #tpu.memory_space<vmem>>, vector<1x128xf32>,
      %cst_20 = arith.constant 0.000000e+00 : f32
      %27 = vector.broadcast %cst_20 : f32 to vector<1x128xf32>
      %c0_21 = arith.constant 0 : index
      %c0_22 = arith.constant 0 : index
      %28 = vector.load %arg11[%c0_21, %c0_22] : memref<1x128xf32, #tpu.memory_space<vmem>>, vector<1x128xf32>
      tpu.vector_store %arg11[%c0_21, %c0_22], %27 {strides = array<i32>} : memref<1x128xf32, #tpu.memory_space<vmem>>, vector<1x128xf32>,
    } else {
    }
    %c0 = arith.constant 0 : index
    %c0_1 = arith.constant 0 : index
    %3 = vector.load %arg1[%c0, %c0_1] : memref<8x784xbf16, #tpu.memory_space<vmem>>, vector<8x784xbf16>
    %c0_2 = arith.constant 0 : index
    %c0_3 = arith.constant 0 : index
    %4 = vector.load %arg2[%c0_2, %c0_3] : memref<784x128xbf16, #tpu.memory_space<vmem>>, vector<784x128xbf16>
    %cst = arith.constant dense<0.000000e+00> : vector<8x128xf32>
    %5 = tpu.matmul %3, %4, %cst {dimension_numbers = #tpu.dot_dimension_numbers<[1], [0], [0], [1], [0, 0, 1, 1], [], []>} : vector<8x784xbf16>, vector<784x128xbf16>, vector<8x128xf32> -> vector<8x128xf32>
    %c0_4 = arith.constant 0 : index
    %c0_5 = arith.constant 0 : index
    %6 = vector.load %arg10[%c0_4, %c0_5] : memref<1x128xf32, #tpu.memory_space<vmem>>, vector<1x128xf32>
    %cst_6 = arith.constant dense<0.000000e+00> : vector<128xf32>
    %7 = vector.multi_reduction <add>, %5, %cst_6 [0] : vector<8x128xf32> to vector<128xf32>
    %8 = vector.shape_cast %7 : vector<128xf32> to vector<1x128xf32>
    %9 = arith.addf %6, %8 : vector<1x128xf32>
    %c0_7 = arith.constant 0 : index
    %c0_8 = arith.constant 0 : index
    %10 = vector.load %arg10[%c0_7, %c0_8] : memref<1x128xf32, #tpu.memory_space<vmem>>, vector<1x128xf32>
    tpu.vector_store %arg10[%c0_7, %c0_8], %9 {strides = array<i32>} : memref<1x128xf32, #tpu.memory_space<vmem>>, vector<1x128xf32>,
    %c0_9 = arith.constant 0 : index
    %c0_10 = arith.constant 0 : index
    %11 = vector.load %arg11[%c0_9, %c0_10] : memref<1x128xf32, #tpu.memory_space<vmem>>, vector<1x128xf32>
    %12 = arith.mulf %5, %5 : vector<8x128xf32>
    %cst_11 = arith.constant dense<0.000000e+00> : vector<128xf32>
    %13 = vector.multi_reduction <add>, %12, %cst_11 [0] : vector<8x128xf32> to vector<128xf32>
    %14 = vector.shape_cast %13 : vector<128xf32> to vector<1x128xf32>
    %15 = arith.addf %11, %14 : vector<1x128xf32>
    %c0_12 = arith.constant 0 : index
    %c0_13 = arith.constant 0 : index
    %16 = vector.load %arg11[%c0_12, %c0_13] : memref<1x128xf32, #tpu.memory_space<vmem>>, vector<1x128xf32>
    tpu.vector_store %arg11[%c0_12, %c0_13], %15 {strides = array<i32>} : memref<1x128xf32, #tpu.memory_space<vmem>>, vector<1x128xf32>,
    %c8_i32 = arith.constant 8 : i32
    %17 = arith.muli %arg0, %c8_i32 : i32
    %18 = tpu.assume_multiple %17, 8 : i32
    %19 = arith.truncf %5 : vector<8x128xf32> to vector<8x128xbf16>
    %20 = arith.index_cast %18 : i32 to index
    %c0_14 = arith.constant 0 : index
    %21 = vector.load %arg9[%20, %c0_14] : memref<8x128xbf16, #tpu.memory_space<vmem>>, vector<8x128xbf16>
    tpu.vector_store %arg9[%20, %c0_14], %19 {strides = array<i32>} : memref<8x128xbf16, #tpu.memory_space<vmem>>, vector<8x128xbf16>,
    %c0_i32_15 = arith.constant 0 : i32
    %22 = arith.cmpi eq, %arg0, %c0_i32_15 : i32
    %23 = arith.extui %22 : i1 to i32
    %c0_i32_16 = arith.constant 0 : i32
    %24 = arith.cmpi ne, %23, %c0_i32_16 : i32
    scf.if %24 {
      %c0_17 = arith.constant 0 : index
      %c0_18 = arith.constant 0 : index
      %25 = vector.load %arg10[%c0_17, %c0_18] : memref<1x128xf32, #tpu.memory_space<vmem>>, vector<1x128xf32>
      %cst_19 = arith.constant 1.250000e-01 : f32
      %26 = vector.broadcast %cst_19 : f32 to vector<1x128xf32>
      %27 = arith.mulf %25, %26 : vector<1x128xf32>
      %c0_20 = arith.constant 0 : index
      %c0_21 = arith.constant 0 : index
      %28 = vector.load %arg11[%c0_20, %c0_21] : memref<1x128xf32, #tpu.memory_space<vmem>>, vector<1x128xf32>
      %cst_22 = arith.constant 1.250000e-01 : f32
      %29 = vector.broadcast %cst_22 : f32 to vector<1x128xf32>
      %30 = arith.mulf %28, %29 : vector<1x128xf32>
      %31 = arith.mulf %27, %27 : vector<1x128xf32>
      %32 = arith.subf %30, %31 : vector<1x128xf32>
      %cst_23 = arith.constant 0.000000e+00 : f32
      %33 = vector.broadcast %cst_23 : f32 to vector<1x128xf32>
      %34 = arith.maximumf %32, %33 : vector<1x128xf32>
      %c0_24 = arith.constant 0 : index
      %c0_25 = arith.constant 0 : index
      %35 = vector.load %arg3[%c0_24, %c0_25] : memref<1x128xf32, #tpu.memory_space<vmem>>, vector<1x128xf32>
      %cst_26 = arith.constant 9.99999974E-6 : f32
      %36 = vector.broadcast %cst_26 : f32 to vector<1x128xf32>
      %37 = arith.addf %34, %36 : vector<1x128xf32>
      %38 = math.rsqrt %37 : vector<1x128xf32>
      %39 = arith.mulf %35, %38 : vector<1x128xf32>
      %c0_27 = arith.constant 0 : index
      %c0_28 = arith.constant 0 : index
      %40 = vector.load %arg4[%c0_27, %c0_28] : memref<1x128xf32, #tpu.memory_space<vmem>>, vector<1x128xf32>
      %41 = arith.mulf %27, %39 : vector<1x128xf32>
      %42 = arith.subf %40, %41 : vector<1x128xf32>
      %c0_29 = arith.constant 0 : index
      %c0_30 = arith.constant 0 : index
      %43 = vector.load %arg5[%c0_29, %c0_30] : memref<128x128xbf16, #tpu.memory_space<vmem>>, vector<128x128xbf16>
      %cst_31 = arith.constant 0.000000e+00 : f32
      %44 = vector.broadcast %cst_31 : f32 to vector<1x128xf32>
      %cst_32 = arith.constant 0.000000e+00 : f32
      %45 = vector.broadcast %cst_32 : f32 to vector<1x128xf32>
      %c0_i32_33 = arith.constant 0 : i32
      %c8_i32_34 = arith.constant 8 : i32
      %46 = arith.muli %c0_i32_33, %c8_i32_34 : i32
      %47 = tpu.assume_multiple %46, 8 : i32
      %48 = arith.index_cast %47 : i32 to index
      %c0_35 = arith.constant 0 : index
      %49 = vector.load %arg9[%48, %c0_35] : memref<8x128xbf16, #tpu.memory_space<vmem>>, vector<8x128xbf16>
      %50 = arith.extf %49 : vector<8x128xbf16> to vector<8x128xf32>
      %51 = vector.broadcast %39 : vector<1x128xf32> to vector<8x128xf32>
      %52 = arith.mulf %50, %51 : vector<8x128xf32>
      %53 = vector.broadcast %42 : vector<1x128xf32> to vector<8x128xf32>
      %54 = arith.addf %52, %53 : vector<8x128xf32>
      %cst_36 = arith.constant 0.000000e+00 : f32
      %55 = vector.broadcast %cst_36 : f32 to vector<8x128xf32>
      %56 = arith.cmpf oge, %54, %55 : vector<8x128xf32>
      %cst_37 = arith.constant 1.000000e+00 : f32
      %cst_38 = arith.constant -1.000000e+00 : f32
      %57 = vector.broadcast %cst_37 : f32 to vector<8x128xf32>
      %58 = vector.broadcast %cst_38 : f32 to vector<8x128xf32>
      %59 = arith.select %56, %57, %58 : vector<8x128xi1>, vector<8x128xf32>
      %60 = arith.truncf %59 : vector<8x128xf32> to vector<8x128xbf16>
      %cst_39 = arith.constant dense<0.000000e+00> : vector<8x128xf32>
      %61 = tpu.matmul %60, %43, %cst_39 {dimension_numbers = #tpu.dot_dimension_numbers<[1], [0], [0], [1], [0, 0, 1, 1], [], []>} : vector<8x128xbf16>, vector<128x128xbf16>, vector<8x128xf32> -> vector<8x128xf32>
      %cst_40 = arith.constant dense<0.000000e+00> : vector<128xf32>
      %62 = vector.multi_reduction <add>, %61, %cst_40 [0] : vector<8x128xf32> to vector<128xf32>
      %63 = vector.shape_cast %62 : vector<128xf32> to vector<1x128xf32>
      %64 = arith.addf %44, %63 : vector<1x128xf32>
      %65 = arith.mulf %61, %61 : vector<8x128xf32>
      %cst_41 = arith.constant dense<0.000000e+00> : vector<128xf32>
      %66 = vector.multi_reduction <add>, %65, %cst_41 [0] : vector<8x128xf32> to vector<128xf32>
      %67 = vector.shape_cast %66 : vector<128xf32> to vector<1x128xf32>
      %68 = arith.addf %45, %67 : vector<1x128xf32>
      %c1_i32 = arith.constant 1 : i32
      %cst_42 = arith.constant 1.250000e-01 : f32
      %69 = vector.broadcast %cst_42 : f32 to vector<1x128xf32>
      %70 = arith.mulf %64, %69 : vector<1x128xf32>
      %cst_43 = arith.constant 1.250000e-01 : f32
      %71 = vector.broadcast %cst_43 : f32 to vector<1x128xf32>
      %72 = arith.mulf %68, %71 : vector<1x128xf32>
      %73 = arith.mulf %70, %70 : vector<1x128xf32>
      %74 = arith.subf %72, %73 : vector<1x128xf32>
      %cst_44 = arith.constant 0.000000e+00 : f32
      %75 = vector.broadcast %cst_44 : f32 to vector<1x128xf32>
      %76 = arith.maximumf %74, %75 : vector<1x128xf32>
      %c0_45 = arith.constant 0 : index
      %c0_46 = arith.constant 0 : index
      %77 = vector.load %arg6[%c0_45, %c0_46] : memref<1x128xf32, #tpu.memory_space<vmem>>, vector<1x128xf32>
      %cst_47 = arith.constant 9.99999974E-6 : f32
      %78 = vector.broadcast %cst_47 : f32 to vector<1x128xf32>
      %79 = arith.addf %76, %78 : vector<1x128xf32>
      %80 = math.rsqrt %79 : vector<1x128xf32>
      %81 = arith.mulf %77, %80 : vector<1x128xf32>
      %c0_48 = arith.constant 0 : index
      %c0_49 = arith.constant 0 : index
      %82 = vector.load %arg7[%c0_48, %c0_49] : memref<1x128xf32, #tpu.memory_space<vmem>>, vector<1x128xf32>
      %83 = arith.mulf %70, %81 : vector<1x128xf32>
      %84 = arith.subf %82, %83 : vector<1x128xf32>
      %c0_i32_50 = arith.constant 0 : i32
      %c1_i32_51 = arith.constant 1 : i32
      %85 = arith.andi %c0_i32_50, %c1_i32_51 : i32
      %c8_i32_52 = arith.constant 8 : i32
      %86 = arith.muli %c0_i32_50, %c8_i32_52 : i32
      %87 = tpu.assume_multiple %86, 8 : i32
      %c2_i32 = arith.constant 2 : i32
      %88 = arith.cmpi sge, %c0_i32_50, %c2_i32 : i32
      %89 = arith.extui %88 : i1 to i32
      %c0_i32_53 = arith.constant 0 : i32
      %90 = arith.cmpi ne, %89, %c0_i32_53 : i32
      scf.if %90 {
        %c0_i32_74 = arith.constant 0 : i32
        %c0_i32_75 = arith.constant 0 : i32
        %135 = tpu.memref_slice %arg12[%85, %c0_i32_74, %c0_i32_75] : memref<2x8x128xf32, #tpu.memory_space<vmem>> -> memref<1x8x128xf32, #tpu.memory_space<vmem>>
        %136 = tpu.memref_squeeze %135 : memref<1x8x128xf32, #tpu.memory_space<vmem>> -> memref<8x128xf32, #tpu.memory_space<vmem>>
        %c0_i32_76 = arith.constant 0 : i32
        %137 = tpu.memref_slice %arg8[%87, %c0_i32_76] : memref<8x128xf32, #tpu.memory_space<any>> -> memref<8x128xf32, #tpu.memory_space<any>>
        %138 = tpu.memref_slice %arg13[%85] : memref<2x!tpu.dma_semaphore, #tpu.memory_space<semaphore_mem>> -> memref<1x!tpu.dma_semaphore, #tpu.memory_space<semaphore_mem>>
        %139 = tpu.memref_squeeze %138 : memref<1x!tpu.dma_semaphore, #tpu.memory_space<semaphore_mem>> -> memref<!tpu.dma_semaphore, #tpu.memory_space<semaphore_mem>>
        tpu.wait_dma2 semaphore(%139 : memref<!tpu.dma_semaphore, #tpu.memory_space<semaphore_mem>>) src(%136 : memref<8x128xf32, #tpu.memory_space<vmem>>) dst(%137 : memref<8x128xf32, #tpu.memory_space<any>>)
      } else {
      }
      %c8_i32_54 = arith.constant 8 : i32
      %91 = arith.muli %c0_i32_50, %c8_i32_54 : i32
      %92 = tpu.assume_multiple %91, 8 : i32
      %93 = arith.index_cast %92 : i32 to index
      %c0_55 = arith.constant 0 : index
      %94 = vector.load %arg9[%93, %c0_55] : memref<8x128xbf16, #tpu.memory_space<vmem>>, vector<8x128xbf16>
      %95 = arith.extf %94 : vector<8x128xbf16> to vector<8x128xf32>
      %96 = vector.broadcast %39 : vector<1x128xf32> to vector<8x128xf32>
      %97 = arith.mulf %95, %96 : vector<8x128xf32>
      %98 = vector.broadcast %42 : vector<1x128xf32> to vector<8x128xf32>
      %99 = arith.addf %97, %98 : vector<8x128xf32>
      %cst_56 = arith.constant 0.000000e+00 : f32
      %100 = vector.broadcast %cst_56 : f32 to vector<8x128xf32>
      %101 = arith.cmpf oge, %99, %100 : vector<8x128xf32>
      %cst_57 = arith.constant 1.000000e+00 : f32
      %cst_58 = arith.constant -1.000000e+00 : f32
      %102 = vector.broadcast %cst_57 : f32 to vector<8x128xf32>
      %103 = vector.broadcast %cst_58 : f32 to vector<8x128xf32>
      %104 = arith.select %101, %102, %103 : vector<8x128xi1>, vector<8x128xf32>
      %105 = arith.truncf %104 : vector<8x128xf32> to vector<8x128xbf16>
      %cst_59 = arith.constant dense<0.000000e+00> : vector<8x128xf32>
      %106 = tpu.matmul %105, %43, %cst_59 {dimension_numbers = #tpu.dot_dimension_numbers<[1], [0], [0], [1], [0, 0, 1, 1], [], []>} : vector<8x128xbf16>, vector<128x128xbf16>, vector<8x128xf32> -> vector<8x128xf32>
      %107 = vector.broadcast %81 : vector<1x128xf32> to vector<8x128xf32>
      %108 = arith.mulf %106, %107 : vector<8x128xf32>
      %109 = vector.broadcast %84 : vector<1x128xf32> to vector<8x128xf32>
      %110 = arith.addf %108, %109 : vector<8x128xf32>
      %cst_60 = arith.constant dense<0xFF800000> : vector<8xf32>
      %111 = vector.multi_reduction <maximumf>, %110, %cst_60 [1] : vector<8x128xf32> to vector<8xf32>
      %112 = vector.shape_cast %111 : vector<8xf32> to vector<8x1xf32>
      %113 = vector.broadcast %112 : vector<8x1xf32> to vector<8x128xf32>
      %114 = arith.subf %110, %113 : vector<8x128xf32>
      %115 = math.exp %114 : vector<8x128xf32>
      %cst_61 = arith.constant dense<0.000000e+00> : vector<8xf32>
      %116 = vector.multi_reduction <add>, %115, %cst_61 [1] : vector<8x128xf32> to vector<8xf32>
      %117 = vector.shape_cast %116 : vector<8xf32> to vector<8x1xf32>
      %118 = math.log %117 : vector<8x1xf32>
      %119 = vector.broadcast %118 : vector<8x1xf32> to vector<8x128xf32>
      %120 = arith.subf %114, %119 : vector<8x128xf32>
      %121 = arith.index_cast %85 : i32 to index
      %c0_62 = arith.constant 0 : index
      %c0_63 = arith.constant 0 : index
      %122 = vector.load %arg12[%121, %c0_62, %c0_63] : memref<2x8x128xf32, #tpu.memory_space<vmem>>, vector<1x8x128xf32>
      %123 = vector.shape_cast %122 : vector<1x8x128xf32> to vector<8x128xf32>
      %124 = vector.shape_cast %120 : vector<8x128xf32> to vector<1x8x128xf32>
      tpu.vector_store %arg12[%121, %c0_62, %c0_63], %124 {strides = array<i32>} : memref<2x8x128xf32, #tpu.memory_space<vmem>>, vector<1x8x128xf32>,
      %c0_i32_64 = arith.constant 0 : i32
      %c0_i32_65 = arith.constant 0 : i32
      %125 = tpu.memref_slice %arg12[%85, %c0_i32_64, %c0_i32_65] : memref<2x8x128xf32, #tpu.memory_space<vmem>> -> memref<1x8x128xf32, #tpu.memory_space<vmem>>
      %126 = tpu.memref_squeeze %125 : memref<1x8x128xf32, #tpu.memory_space<vmem>> -> memref<8x128xf32, #tpu.memory_space<vmem>>
      %c0_i32_66 = arith.constant 0 : i32
      %127 = tpu.memref_slice %arg8[%87, %c0_i32_66] : memref<8x128xf32, #tpu.memory_space<any>> -> memref<8x128xf32, #tpu.memory_space<any>>
      %128 = tpu.memref_slice %arg13[%85] : memref<2x!tpu.dma_semaphore, #tpu.memory_space<semaphore_mem>> -> memref<1x!tpu.dma_semaphore, #tpu.memory_space<semaphore_mem>>
      %129 = tpu.memref_squeeze %128 : memref<1x!tpu.dma_semaphore, #tpu.memory_space<semaphore_mem>> -> memref<!tpu.dma_semaphore, #tpu.memory_space<semaphore_mem>>
      tpu.enqueue_dma source(%126 : memref<8x128xf32, #tpu.memory_space<vmem>>) target(%127 : memref<8x128xf32, #tpu.memory_space<any>>) target_semaphore(%129 : memref<!tpu.dma_semaphore, #tpu.memory_space<semaphore_mem>>)
      %c1_i32_67 = arith.constant 1 : i32
      %c0_i32_68 = arith.constant 0 : i32
      %c0_i32_69 = arith.constant 0 : i32
      %c0_i32_70 = arith.constant 0 : i32
      %c0_i32_71 = arith.constant 0 : i32
      %130 = tpu.memref_slice %arg12[%c0_i32_68, %c0_i32_70, %c0_i32_71] : memref<2x8x128xf32, #tpu.memory_space<vmem>> -> memref<1x8x128xf32, #tpu.memory_space<vmem>>
      %131 = tpu.memref_squeeze %130 : memref<1x8x128xf32, #tpu.memory_space<vmem>> -> memref<8x128xf32, #tpu.memory_space<vmem>>
      %c0_i32_72 = arith.constant 0 : i32
      %c0_i32_73 = arith.constant 0 : i32
      %132 = tpu.memref_slice %arg8[%c0_i32_72, %c0_i32_73] : memref<8x128xf32, #tpu.memory_space<any>> -> memref<8x128xf32, #tpu.memory_space<any>>
      %133 = tpu.memref_slice %arg13[%c0_i32_69] : memref<2x!tpu.dma_semaphore, #tpu.memory_space<semaphore_mem>> -> memref<1x!tpu.dma_semaphore, #tpu.memory_space<semaphore_mem>>
      %134 = tpu.memref_squeeze %133 : memref<1x!tpu.dma_semaphore, #tpu.memory_space<semaphore_mem>> -> memref<!tpu.dma_semaphore, #tpu.memory_space<semaphore_mem>>
      tpu.wait_dma2 semaphore(%134 : memref<!tpu.dma_semaphore, #tpu.memory_space<semaphore_mem>>) src(%131 : memref<8x128xf32, #tpu.memory_space<vmem>>) dst(%132 : memref<8x128xf32, #tpu.memory_space<any>>)
    } else {
    }
    return
  }
  func.func @transform_0(%arg0: i32) -> (i32, i32) {
    %c0_i32 = arith.constant 0 : i32
    %c0_i32_0 = arith.constant 0 : i32
    return %arg0, %c0_i32 : i32, i32
  }
  func.func @transform_1(%arg0: i32) -> (i32, i32) {
    %c0_i32 = arith.constant 0 : i32
    %c0_i32_0 = arith.constant 0 : i32
    %c0_i32_1 = arith.constant 0 : i32
    return %c0_i32, %c0_i32_0 : i32, i32
  }
  func.func @transform_2(%arg0: i32) -> (i32, i32) {
    %c0_i32 = arith.constant 0 : i32
    %c0_i32_0 = arith.constant 0 : i32
    %c0_i32_1 = arith.constant 0 : i32
    return %c0_i32, %c0_i32_0 : i32, i32
  }
  func.func @transform_3(%arg0: i32) -> (i32, i32) {
    %c0_i32 = arith.constant 0 : i32
    %c0_i32_0 = arith.constant 0 : i32
    %c0_i32_1 = arith.constant 0 : i32
    return %c0_i32, %c0_i32_0 : i32, i32
  }
  func.func @transform_4(%arg0: i32) -> (i32, i32) {
    %c0_i32 = arith.constant 0 : i32
    %c0_i32_0 = arith.constant 0 : i32
    %c0_i32_1 = arith.constant 0 : i32
    return %c0_i32, %c0_i32_0 : i32, i32
  }
  func.func @transform_5(%arg0: i32) -> (i32, i32) {
    %c0_i32 = arith.constant 0 : i32
    %c0_i32_0 = arith.constant 0 : i32
    %c0_i32_1 = arith.constant 0 : i32
    return %c0_i32, %c0_i32_0 : i32, i32
  }
  func.func @transform_6(%arg0: i32) -> (i32, i32) {
    %c0_i32 = arith.constant 0 : i32
    %c0_i32_0 = arith.constant 0 : i32
    %c0_i32_1 = arith.constant 0 : i32
    return %c0_i32, %c0_i32_0 : i32, i32
  }
}

</mosaic_0001>

<bundles_post_ra>
// kernel: tpu_custom_call.1
= control target key start
LH: loop header
LB: loop body
LE: loop exit
PB: predicated region body
PF: predicated region fallthrough
CT: control target
= control target key end

     0   :  { %12 = vsyncpa [#allocation8], 0  ;;  %s1380_s0 = inlined_call_operand.hbm [shape: bf16[8,784], index: 0, kind: input, shape index: {}]   ;;  %s1381_s1 = inlined_call_operand.hbm [shape: bf16[784,128], index: 1, kind: input, shape index: {}]   ;;  %s1382_s2 = inlined_call_operand.vmem [shape: f32[1,128], index: 2, kind: input, shape index: {}]   ;;  %s1383_s3 = inlined_call_operand.vmem [shape: f32[1,128], index: 3, kind: input, shape index: {}]   ;;  %s1384_s4 = inlined_call_operand.hbm [shape: bf16[128,128], index: 4, kind: input, shape index: {}]   ;;  %s1385_s5 = inlined_call_operand.vmem [shape: f32[1,128], index: 5, kind: input, shape index: {}]   ;;  %s1386_s6 = inlined_call_operand.vmem [shape: f32[1,128], index: 6, kind: input, shape index: {}]   ;;  %s1387_s7 = inlined_call_operand.hbm [shape: f32[8,128], index: 7, kind: output, shape index: {}]  }
   0x1   :  { %13 = vsyncpa [#allocation10], 0  ;;  %s1250_s24 = smov [#allocation9]   ;;  %s1156_s28 = scalar_lea.hbm %s1381_s1, 6272 }
   0x2   :  { %s29_s25 = sshll.u32 %s1250_s24, 4  ;;  %p1157_p0 = scmp.ne.s32.totalorder %s1381_s1, %s1156_s28  ;;  %s30_s25 = int_to_ptr.vmem [resolvable:$true] %s29_s25 }
   0x3   :  { %p1160_p1 = scmp.lt.u32.totalorder %s1156_s28, %s1381_s1 }
   0x5   :  { %p1162_p2 = pnand %p1160_p1, %p1157_p0 }
   0x7   :  { %1165 = shalt.err (!%p1162_p2)
}
   0x8   :  { %s1166_s10 = scalar_lea.vmem %s30_s25, 6272  ;;  %p1171_p4 = scmp.lt.s32.totalorder %s30_s25, %s30_s25 }
   0x9   :  { %p1167_p3 = scmp.ne.s32.totalorder %s30_s25, %s1166_s10  ;;  %p1172_p5 = scmp.lt.s32.totalorder %s1166_s10, %s1166_s10 }
   0xb   :  { %p1173_p6 = por %p1172_p5, %p1171_p4 }
   0xd   :  { %p1174_p7 = pnand %p1173_p6, %p1167_p3 }
   0xf   :  { %1177 = shalt.err (!%p1174_p7)
}
  0x10   :  { %s1251_s11 = smov 64   ;;  %s1252_s12 = smov 4  }
  0x11   :  { %35 = dma.hbm_to_vmem [thread:$0]  %s1381_s1, 6272, %s30_s25, [#allocation10], %s1251_s11, %s1251_s11, %s1252_s12  }
  0x12   :  { %s1253_s15 = smov [#allocation7]   ;;  %s1254_s17 = smov [#allocation11]  }
  0x13   :  { %s20_s16 = sshll.u32 %s1253_s15, 4  ;;  %s45_s18 = sshll.u32 %s1254_s17, 4  ;;  %s21_s16 = int_to_ptr.vmem [resolvable:$true] %s20_s16  ;;  %s46_s18 = int_to_ptr.vmem [resolvable:$true] %s45_s18 }
  0x14   :  { %s1178_s21 = scalar_lea.hbm %s1380_s0, 448 }
  0x15   :  { %p1179_p8 = scmp.ne.s32.totalorder %s1380_s0, %s1178_s21  ;;  %p1182_p9 = scmp.lt.u32.totalorder %s1178_s21, %s1380_s0 }
  0x17   :  { %p1184_p10 = pnand %p1182_p9, %p1179_p8 }
  0x19   :  { %1187 = shalt.err (!%p1184_p10)
}
  0x1a   :  { %s1188_s1 = scalar_lea.vmem %s21_s16, 448  ;;  %p1193_p12 = scmp.lt.s32.totalorder %s21_s16, %s21_s16 }
  0x1b   :  { %p1189_p11 = scmp.ne.s32.totalorder %s21_s16, %s1188_s1  ;;  %p1194_p13 = scmp.lt.s32.totalorder %s1188_s1, %s1188_s1 }
  0x1d   :  { %p1195_p0 = por %p1194_p13, %p1193_p12 }
  0x1f   :  { %p1196_p1 = pnand %p1195_p0, %p1189_p11 }
  0x21   :  { %1199 = shalt.err (!%p1196_p1)
}
  0x22   :  { %23 = dma.hbm_to_vmem [thread:$0]  %s1380_s0, 448, %s21_s16, [#allocation8]  }
  0x23   :  { %s1200_s30 = scalar_lea.hbm %s1384_s4, 1024 }
  0x24   :  { %p1201_p2 = scmp.ne.s32.totalorder %s1384_s4, %s1200_s30  ;;  %p1204_p3 = scmp.lt.u32.totalorder %s1200_s30, %s1384_s4 }
  0x26   :  { %p1206_p4 = pnand %p1204_p3, %p1201_p2 }
  0x28   :  { %1209 = shalt.err (!%p1206_p4)
}
  0x29   :  { %s1210_s14 = scalar_lea.vmem %s46_s18, 1024  ;;  %p1215_p6 = scmp.lt.s32.totalorder %s46_s18, %s46_s18 }
  0x2a   :  { %p1211_p5 = scmp.ne.s32.totalorder %s46_s18, %s1210_s14  ;;  %p1216_p7 = scmp.lt.s32.totalorder %s1210_s14, %s1210_s14 }
  0x2c   :  { %p1217_p8 = por %p1216_p7, %p1215_p6 }
  0x2e   :  { %p1218_p9 = pnand %p1217_p8, %p1211_p5 }
  0x30   :  { %1221 = shalt.err (!%p1218_p9)
}
  0x31   :  { %51 = dma.hbm_to_vmem [thread:$0]  %s1384_s4, 1024, %s46_s18, [#allocation10], %s1251_s11, %s1251_s11, %s1252_s12  }
  0x32   :  { %1244 = dma.done.wait [#allocation8], 448  }
  0x33   :  { %1245 = vsyncadd [#allocation8], 4294966848 }
  0x34   :  { %1246 = dma.done.wait [#allocation10], 7296  }
  0x35   :  { %1247 = vsyncadd [#allocation10], 4294960000  ;;  %v1255_v0 = vmov 0.0   ;;  %v1084_v1 = vld [vmem:[#allocation9 + $0x40] sm:$0xff]   ;;  %v1088_v5 = vld [vmem:[#allocation9 + $0x48] sm:$0xff]   ;;  %vm1256_vm0 = vmmov 0  }
  0x36   :  { %70 = vst [vmem:[#allocation3] sm:$0x1] %v1255_v0  ;;  %71 = vst [vmem:[#allocation4] sm:$0x1] %v1255_v0  ;;  %v1085_v2 = vld [vmem:[#allocation9 + $0xc0] sm:$0xff]   ;;  %972 = vmatprep.subr.bf16.mxu0 %v1084_v1  ;;  %v1089_v6 = vld [vmem:[#allocation9 + $0xc8] sm:$0xff]  }
  0x37   :  { %v1086_v3 = vld [vmem:[#allocation9] sm:$0xff]   ;;  %994 = vmatprep.subr.bf16.mxu1 %v1085_v2  ;;  %v1090_v7 = vld [vmem:[#allocation9 + $0x8] sm:$0xff]   ;;  %v1092_v9 = vld [vmem:[#allocation9 + $0x50] sm:$0xff]   ;;  %vm492_vm1 = vcmask 130048  }
  0x38   :  { %v1087_v4 = vld [vmem:[#allocation9 + $0x80] sm:$0xff]   ;;  %973 = vmatpush3.bf16.msra.mxu0 %v1086_v3  ;;  %v1091_v8 = vld [vmem:[#allocation9 + $0x88] sm:$0xff]   ;;  %v1093_v10 = vld [vmem:[#allocation9 + $0xd0] sm:$0xff]  }
  0x39   :  { %995 = vmatpush3.bf16.msra.mxu1 %v1087_v4  ;;  %974 = vmatprep.subr.bf16.mxu0 %v1088_v5  ;;  %v1094_v11 = vld [vmem:[#allocation9 + $0x10] sm:$0xff]   ;;  %v1096_v13 = vld [vmem:[#allocation9 + $0x58] sm:$0xff]   ;;  %v1100_v17 = vld [vmem:[#allocation9 + $0x60] sm:$0xff]  }
  0x3a   :  { %996 = vmatprep.subr.bf16.mxu1 %v1089_v6  ;;  %v1095_v12 = vld [vmem:[#allocation9 + $0x90] sm:$0xff]   ;;  %v1097_v14 = vld [vmem:[#allocation9 + $0xd8] sm:$0xff]   ;;  %v1101_v18 = vld [vmem:[#allocation9 + $0xe0] sm:$0xff]  }
  0x3b   :  { %v1098_v15 = vld [vmem:[#allocation9 + $0x18] sm:$0xff]   ;;  %v1102_v19 = vld [vmem:[#allocation9 + $0x20] sm:$0xff]   ;;  %v1104_v21 = vld [vmem:[#allocation9 + $0x68] sm:$0xff]  }
  0x3c   :  { %975 = vmatpush3.bf16.msra.mxu0 %v1090_v7  ;;  %v1099_v16 = vld [vmem:[#allocation9 + $0x98] sm:$0xff]   ;;  %v1103_v20 = vld [vmem:[#allocation9 + $0xa0] sm:$0xff]   ;;  %v1105_v22 = vld [vmem:[#allocation9 + $0xe8] sm:$0xff]  }
  0x3d   :  { %997 = vmatpush3.bf16.msra.mxu1 %v1091_v8  ;;  %976 = vmatprep.subr.bf16.mxu0 %v1092_v9  ;;  %v1106_v23 = vld [vmem:[#allocation9 + $0x28] sm:$0xff]   ;;  %v1108_v25 = vld [vmem:[#allocation9 + $0x70] sm:$0xff]   ;;  %v1112_v29 = vld [vmem:[#allocation9 + $0x78] sm:$0xff]  }
  0x3e   :  { %998 = vmatprep.subr.bf16.mxu1 %v1093_v10  ;;  %v1107_v24 = vld [vmem:[#allocation9 + $0xa8] sm:$0xff]   ;;  %v1109_v26 = vld [vmem:[#allocation9 + $0xf0] sm:$0xff]   ;;  %v1113_v30 = vld [vmem:[#allocation9 + $0xf8] sm:$0xff]  }
  0x3f   :  { %v1110_v27 = vld [vmem:[#allocation9 + $0x30] sm:$0xff]   ;;  %v1114_v31 = vld [vmem:[#allocation9 + $0x38] sm:$0xff]   ;;  %v72_v33 = vld [vmem:[#allocation7] sm:$0xff] }
  0x40   :  { %977 = vmatpush3.bf16.msra.mxu0 %v1094_v11  ;;  %v1111_v28 = vld [vmem:[#allocation9 + $0xb0] sm:$0xff]   ;;  %v1115_v32 = vld [vmem:[#allocation9 + $0xb8] sm:$0xff]   ;;  %v905_v35 = vcombine.low %v72_v33, %v72_v33  ;;  %v906_v36 = vcombine.high %v72_v33, %v72_v33  ;;  %v1120_v39 = vld [vmem:[#allocation9 + $0x140] sm:$0xff]  }
  0x41   :  { %999 = vmatpush3.bf16.msra.mxu1 %v1095_v12  ;;  %978 = vmatprep.subr.bf16.mxu0 %v1096_v13  ;;  %v73_v34 = vld [vmem:[#allocation7 + $0x8] sm:$0xff]  ;;  %v1121_v40 = vld [vmem:[#allocation9 + $0x100] sm:$0xff]   ;;  %v1126_v45 = vld [vmem:[#allocation9 + $0x158] sm:$0xff]  }
  0x42   :  { %1000 = vmatprep.subr.bf16.mxu1 %v1097_v14  ;;  %v907_v37 = vcombine.low %v73_v34, %v73_v34  ;;  %v908_v38 = vcombine.high %v73_v34, %v73_v34  ;;  %528 = vmatprep.mubr.bf16.mxu0 %v906_v36  ;;  %v1122_v41 = vld [vmem:[#allocation9 + $0x148] sm:$0xff]   ;;  %v1124_v43 = vld [vmem:[#allocation9 + $0x150] sm:$0xff]   ;;  %v1127_v46 = vld [vmem:[#allocation9 + $0x118] sm:$0xff]  }
  0x43   :  { %v1123_v42 = vld [vmem:[#allocation9 + $0x108] sm:$0xff]   ;;  %v1125_v44 = vld [vmem:[#allocation9 + $0x110] sm:$0xff]   ;;  %v1128_v47 = vld [vmem:[#allocation9 + $0x160] sm:$0xff]  }
  0x44   :  { %979 = vmatpush3.bf16.msra.mxu0 %v1098_v15  ;;  %568 = vmatprep.mubr.bf16.mxu1 %v908_v38  ;;  %v1129_v48 = vld [vmem:[#allocation9 + $0x120] sm:$0xff]   ;;  %v1130_v49 = vld [vmem:[#allocation9 + $0x168] sm:$0xff]   ;;  %v74_v51 = vld [vmem:[#allocation7 + $0x10] sm:$0xff] }
  0x45   :  { %1001 = vmatpush3.bf16.msra.mxu1 %v1099_v16  ;;  %980 = vmatprep.subr.bf16.mxu0 %v1100_v17  ;;  %v1136_v50 = vld [vmem:[#allocation9 + $0x180] sm:$0xff]   ;;  %v910_v52 = vcombine.high %v74_v51, %v74_v51  ;;  %v1139_v53 = vld [vmem:[#allocation7 + $0x18] ss:$0 sps:$4 sm:$0xff]   ;;  %v1131_v54 = vld [vmem:[#allocation9 + $0x128] sm:$0xff]   ;;  %v909_v59 = vcombine.low %v74_v51, %v74_v51 }
  0x46   :  { %1002 = vmatprep.subr.bf16.mxu1 %v1101_v18  ;;  %v1132_v55 = vld [vmem:[#allocation9 + $0x170] sm:$0xff]   ;;  %v1134_v57 = vld [vmem:[#allocation9 + $0x178] sm:$0xff]   ;;  %v1140_v60 = vld [vmem:[#allocation11] sm:$0xff]  }
  0x47   :  { %v1133_v56 = vld [vmem:[#allocation9 + $0x130] sm:$0xff]   ;;  %v1135_v58 = vld [vmem:[#allocation9 + $0x138] sm:$0xff]   ;;  %v1143_v63 = vld [vmem:[#allocation11 + $0x18] sm:$0xff]  }
  0x48   :  { %981 = vmatpush3.bf16.msra.mxu0 %v1102_v19  ;;  %v1141_v61 = vld [vmem:[#allocation11 + $0x8] sm:$0xff]   ;;  %v1142_v62 = vld [vmem:[#allocation11 + $0x10] sm:$0xff]   ;;  %v1144_v1 = vld [vmem:[#allocation11 + $0x20] sm:$0xff]  }
  0x49   :  { %1003 = vmatpush3.bf16.msra.mxu1 %v1103_v20  ;;  %982 = vmatprep.subr.bf16.mxu0 %v1104_v21  ;;  %v1145_v2 = vld [vmem:[#allocation11 + $0x28] sm:$0xff]   ;;  %v1146_v3 = vld [vmem:[#allocation11 + $0x30] sm:$0xff]   ;;  %v1147_v4 = vld [vmem:[#allocation11 + $0x38] sm:$0xff]  }
  0x4a   :  { %1004 = vmatprep.subr.bf16.mxu1 %v1105_v22 }
  0x4c   :  { %983 = vmatpush3.bf16.msra.mxu0 %v1106_v23 }
  0x4d   :  { %1005 = vmatpush3.bf16.msra.mxu1 %v1107_v24  ;;  %984 = vmatprep.subr.bf16.mxu0 %v1108_v25 }
  0x4e   :  { %1006 = vmatprep.subr.bf16.mxu1 %v1109_v26 }
  0x50   :  { %985 = vmatpush3.bf16.msra.mxu0 %v1110_v27 }
  0x51   :  { %1007 = vmatpush3.bf16.msra.mxu1 %v1111_v28  ;;  %986 = vmatprep.subr.bf16.mxu0 %v1112_v29 }
  0x52   :  { %1008 = vmatprep.subr.bf16.mxu1 %v1113_v30 }
  0x54   :  { %987 = vmatpush3.bf16.msra.mxu0 %v1114_v31 }
  0x55   :  { %1009 = vmatpush3.bf16.msra.mxu1 %v1115_v32  ;;  %1016 = vmatprep.subr.bf16.mxu0 %v1120_v39 }
  0x56   :  { %1049 = vmatprep.subr.bf16.mxu1 %v1255_v0 }
  0x57   :  { %529 = vmatmul.mubr.bf16.vlgmr.msra.gmra.mrb[0].mxu0 %v905_v35 }
  0x58   :  { %569 = vmatmul.mubr.bf16.vlgmr.msra.gmra.mrb[0].mxu1 %v907_v37  ;;  %1017 = vmatpush3.bf16.msra.mxu0 %v1121_v40  ;;  %v656_v37 = vld [vmem:[#allocation3] sm:$0x1]  ;;  %v665_v40 = vld [vmem:[#allocation4] sm:$0x1] }
  0x59   :  { %1051 = vmatprep.mubr.msk.bf16.mxu1 %vm1256_vm0, %v1255_v0  ;;  %1018 = vmatprep.subr.bf16.mxu0 %v1122_v41 }
  0x5a   :  { %1050 = vmatpush3.bf16.msra.mxu1 %v1136_v50  ;;  %608 = vmatprep.mubr.bf16.mxu0 %v910_v52  ;;  %v718_v52 = vlaneseq }
  0x5b   :  { %1055 = vmatprep.subr.bf16.mxu1 %v1255_v0 }
  0x5c   :  { %1019 = vmatpush3.bf16.msra.mxu0 %v1123_v42 }
  0x5d   :  { %1020 = vmatprep.subr.bf16.mxu0 %v1124_v43 }
  0x60   :  { %1021 = vmatpush3.bf16.msra.mxu0 %v1125_v44  ;;  %1052 = vmatmul.mubr.msk.bf16.vlgmr.msra.gmra.mrb[4].mxu1 %vm492_vm1, %v1139_v53  ;;  %v719_v53 = vshrl.u32 %v718_v52, 7 }
  0x61   :  { %1022 = vmatprep.subr.bf16.mxu0 %v1126_v45  ;;  %1071 = vmatprep.mubr.msk.bf16.mxu1 %vm1256_vm0, %v1255_v0 }
  0x62   :  { %1056 = vmatpush3.bf16.msra.mxu1 %v1140_v60 }
  0x63   :  { %1057 = vmatprep.subr.bf16.mxu1 %v1255_v0 }
  0x64   :  { %1023 = vmatpush3.bf16.msra.mxu0 %v1127_v46 }
  0x65   :  { %1024 = vmatprep.subr.bf16.mxu0 %v1128_v47 }
  0x66   :  { %1058 = vmatpush3.bf16.msra.mxu1 %v1141_v61 }
  0x67   :  { %1059 = vmatprep.subr.bf16.mxu1 %v1255_v0 }
  0x68   :  { %1025 = vmatpush3.bf16.msra.mxu0 %v1129_v48 }
  0x69   :  { %1026 = vmatprep.subr.bf16.mxu0 %v1130_v49 }
  0x6a   :  { %1060 = vmatpush3.bf16.msra.mxu1 %v1142_v62 }
  0x6b   :  { %1061 = vmatprep.subr.bf16.mxu1 %v1255_v0 }
  0x6c   :  { %1027 = vmatpush3.bf16.msra.mxu0 %v1131_v54  ;;  %v692_v54 = vld [vmem:[%s1382_s2] sm:$0x1] }
  0x6d   :  { %1028 = vmatprep.subr.bf16.mxu0 %v1132_v55  ;;  %v720_v55 = vsub.s32 0, %v719_v53 }
  0x6e   :  { %1062 = vmatpush3.bf16.msra.mxu1 %v1143_v63 }
  0x6f   :  { %1063 = vmatprep.subr.bf16.mxu1 %v1255_v0 }
  0x70   :  { %1029 = vmatpush3.bf16.msra.mxu0 %v1133_v56 }
  0x71   :  { %1030 = vmatprep.subr.bf16.mxu0 %v1134_v57 }
  0x72   :  { %1064 = vmatpush3.bf16.msra.mxu1 %v1144_v1 }
  0x73   :  { %1065 = vmatprep.subr.bf16.mxu1 %v1255_v0 }
  0x74   :  { %1031 = vmatpush3.bf16.msra.mxu0 %v1135_v58  ;;  %v696_v58 = vld [vmem:[%s1383_s3] sm:$0x1] }
  0x76   :  { %1066 = vmatpush3.bf16.msra.mxu1 %v1145_v2 }
  0x77   :  { %609 = vmatmul.mubr.bf16.vlgmr.msra.gmra.mrb[4].mxu0 %v909_v59  ;;  %1067 = vmatprep.subr.bf16.mxu1 %v1255_v0 }
  0x7a   :  { %1068 = vmatpush3.bf16.msra.mxu1 %v1146_v3 }
  0x7b   :  { %1069 = vmatprep.subr.bf16.mxu1 %v1255_v0 }
  0x7e   :  { %1070 = vmatpush3.bf16.msra.mxu1 %v1147_v4  ;;  %v1257_v4 = vmov -1.0  }
 0x12a   :  { %v988_v5 = vpop.f32.mrb[0].mxu0 }
 0x12b   :  { %v1010_v6 = vpop.f32.mrb[0].mxu1  ;;  %v989_v7 = vpop.f32.mrb[1].mxu0 }
 0x12c   :  { %v1011_v8 = vpop.f32.mrb[1].mxu1  ;;  %v990_v9 = vadd.f32 %v989_v7, %v988_v5  ;;  %v991_v11 = vpop.f32.mrb[2].mxu0 }
 0x12d   :  { %v1012_v10 = vadd.f32 %v1011_v8, %v1010_v6  ;;  %v1013_v12 = vpop.f32.mrb[2].mxu1  ;;  %v992_v13 = vpop.f32.mrb[3].mxu0 }
 0x12e   :  { %v1014_v14 = vpop.f32.mrb[3].mxu1 }
 0x12f   :  { %v571_v15 = vadd.f32 %v1012_v10, %v990_v9 }
 0x133   :  { %v650_v16 = vpop.f32.mrb[4].mxu1 }
 0x134   :  { %v1053_v17 = vpop.f32.mrb[5].mxu1 }
 0x135   :  { %v653_v18 = vpop.f32.mrb[6].mxu1 }
 0x136   :  { %v1054_v19 = vpop.f32.mrb[7].mxu1 }
 0x14a   :  { %v1032_v20 = vpop.f32.mrb[4].mxu0 }
 0x14b   :  { %v1033_v21 = vpop.f32.mrb[5].mxu0 }
 0x14c   :  { %v1034_v22 = vadd.f32 %v1033_v21, %v1032_v20  ;;  %v1035_v0 = vpop.f32.mrb[6].mxu0 }
 0x14d   :  { %v1036_v23 = vpop.f32.mrb[7].mxu0 }
 0x14e   :  { %v611_v24 = vadd.f32 %v1034_v22, %v571_v15 }
 0x150   :  { %v651_v25 = vadd.f32 %v650_v16, %v611_v24 }
 0x152   :  { %v657_v26 = vrot.slane %v651_v25, 4  ;;  %v666_v27 = vmul.f32 %v651_v25, %v651_v25  ;;  %v676_v28 = vpack.c.bf16 %v651_v25, %v651_v25 }
 0x154   :  { %v658_v29 = vadd.f32 %v657_v26, %v651_v25  ;;  %v667_v30 = vrot.slane %v666_v27, 4  ;;  %681 = vst [vmem:[#allocation2] sm:$0xf] %v676_v28 }
 0x156   :  { %v659_v31 = vrot.slane %v658_v29, 2  ;;  %v668_v32 = vadd.f32 %v667_v30, %v666_v27 }
 0x158   :  { %v660_v33 = vadd.f32 %v659_v31, %v658_v29  ;;  %v669_v34 = vrot.slane %v668_v32, 2  ;;  %v842_v29 = vld [vmem:[%s1385_s5] sm:$0x1]  ;;  %s1258_s5 = smov [#allocation5]  }
 0x159   :  { %s881_s19 = sshll.u32 %s1258_s5, 4  ;;  %s882_s19 = int_to_ptr.vmem [resolvable:$true] %s881_s19 }
 0x15a   :  { %v661_v35 = vrot.slane %v660_v33, 1  ;;  %v670_v36 = vadd.f32 %v669_v34, %v668_v32  ;;  %v846_v32 = vld [vmem:[%s1386_s6] sm:$0x1]  ;;  %s1222_s6 = scalar_lea.vmem %s882_s19, 128  ;;  %s1226_s20 = scalar_lea.vmem %s882_s19, 256 }
 0x15b   :  { %v715_v59 = vld [vmem:[#allocation2] sm:$0xf]  ;;  %p1223_p10 = scmp.ne.s32.totalorder %s882_s19, %s1222_s6  ;;  %p1227_p11 = scmp.lt.s32.totalorder %s882_s19, %s882_s19 }
 0x15c   :  { %v662_v38 = vadd.f32 %v661_v35, %v660_v33  ;;  %v671_v39 = vrot.slane %v670_v36, 1  ;;  %v716_v63 = vunpack.c.l.bf16 %v715_v59  ;;  %p1228_p12 = scmp.lt.s32.totalorder %s1226_s20, %s1222_s6 }
 0x15e   :  { %v663_v41 = vadd.f32 %v662_v38, %v656_v37  ;;  %v672_v42 = vadd.f32 %v671_v39, %v670_v36  ;;  %p1229_p13 = por %p1228_p12, %p1227_p11 }
 0x160   :  { %664 = vst [vmem:[#allocation3] sm:$0x1] %v663_v41  ;;  %v673_v43 = vadd.f32 %v672_v42, %v665_v40  ;;  %p1230_p0 = pnand %p1229_p13, %p1223_p10 }
 0x162   :  { %674 = vst [vmem:[#allocation4] sm:$0x1] %v673_v43 }
 0x167   :  { %v685_v44 = vld [vmem:[#allocation3] sm:$0x1] }
 0x168   :  { %v686_v45 = vmul.f32 0.125, %v685_v44 }
 0x169   :  { %v687_v46 = vld [vmem:[#allocation4] sm:$0x1] }
 0x16a   :  { %v688_v47 = vmul.f32 0.125, %v687_v46  ;;  %v689_v48 = vmul.f32 %v686_v45, %v686_v45 }
 0x16c   :  { %v690_v49 = vsub.f32 %v688_v47, %v689_v48 }
 0x16e   :  { %v691_v50 = vmax.f32 %v690_v49, 0.0 }
 0x170   :  { %v693_v51 = vadd.f32 1e-05, %v691_v50 }
 0x172   :  { %1148 = vrsqrt.f32 %v693_v51 }
 0x17c   :  { %v1149_v56 = vpop.eup %1148 }
 0x17d   :  { %v695_v57 = vmul.f32 %v1149_v56, %v692_v54 }
 0x17f   :  { %v697_v60 = vmul.f32 %v695_v57, %v686_v45  ;;  %v721_v61 = vrot.slane %v695_v57, %v720_v55 }
 0x181   :  { %v698_v62 = vsub.f32 %v696_v58, %v697_v60  ;;  %v723_v1 = vmul.f32 %v721_v61, %v716_v63 }
 0x183   :  { %v728_v2 = vrot.slane %v698_v62, %v720_v55 }
 0x185   :  { %v730_v3 = vadd.f32 %v728_v2, %v723_v1 }
 0x187   :  { %vm731_vm2 = vcmp.ge.f32.partialorder %v730_v3, 0.0 }
 0x188   :  { %v732_v5 = vsel %vm731_vm2, 1.0, %v1257_v4 }
 0x189   :  { %v733_v6 = vpack.c.bf16 %v732_v5, %v732_v5 }
 0x18b   :  { %1072 = vmatmul.mubr.bf16.vlgmr.msra.gmra.mrb[8].mxu1 %v733_v6 }
 0x25e   :  { %v816_v7 = vpop.f32.mrb[8].mxu1 }
 0x25f   :  { %v822_v8 = vrot.slane %v816_v7, 4  ;;  %v829_v9 = vmul.f32 %v816_v7, %v816_v7  ;;  %v1073_v10 = vpop.f32.mrb[9].mxu1 }
 0x260   :  { %v819_v11 = vpop.f32.mrb[10].mxu1 }
 0x261   :  { %v823_v12 = vadd.f32 %v822_v8, %v816_v7  ;;  %v830_v13 = vrot.slane %v829_v9, 4  ;;  %v1074_v14 = vpop.f32.mrb[11].mxu1 }
 0x263   :  { %v824_v15 = vrot.slane %v823_v12, 2  ;;  %v831_v16 = vadd.f32 %v830_v13, %v829_v9 }
 0x265   :  { %v825_v17 = vadd.f32 %v824_v15, %v823_v12  ;;  %v832_v18 = vrot.slane %v831_v16, 2 }
 0x267   :  { %v826_v19 = vrot.slane %v825_v17, 1  ;;  %v833_v20 = vadd.f32 %v832_v18, %v831_v16 }
 0x269   :  { %v827_v21 = vadd.f32 %v826_v19, %v825_v17  ;;  %v834_v22 = vrot.slane %v833_v20, 1 }
 0x26b   :  { %v835_v0 = vadd.f32 %v834_v22, %v833_v20  ;;  %v837_v23 = vmul.f32 0.125, %v827_v21 }
 0x26d   :  { %v838_v24 = vmul.f32 0.125, %v835_v0  ;;  %v839_v25 = vmul.f32 %v837_v23, %v837_v23 }
 0x26f   :  { %v840_v26 = vsub.f32 %v838_v24, %v839_v25 }
 0x271   :  { %v841_v27 = vmax.f32 %v840_v26, 0.0 }
 0x273   :  { %v843_v28 = vadd.f32 1e-05, %v841_v27 }
 0x275   :  { %1150 = vrsqrt.f32 %v843_v28 }
 0x27f   :  { %v1151_v30 = vpop.eup %1150 }
 0x280   :  { %v845_v31 = vmul.f32 %v1151_v30, %v842_v29 }
 0x282   :  { %v847_v33 = vmul.f32 %v845_v31, %v837_v23  ;;  %v853_v34 = vrot.slane %v845_v31, %v720_v55 }
 0x284   :  { %v848_v35 = vsub.f32 %v846_v32, %v847_v33  ;;  %v855_v36 = vmul.f32 %v853_v34, %v816_v7 }
 0x286   :  { %v860_v37 = vrot.slane %v848_v35, %v720_v55 }
 0x288   :  { %v862_v38 = vadd.f32 %v860_v37, %v855_v36 }
 0x28a   :  { %863 = vmax.xlane.f32.xlu0 %v862_v38 }
 0x317   :  { %v864_v39 = vpop.xlane.xlu0 %863 }
 0x318   :  { %v865_v40 = vsub.f32 %v862_v38, %v864_v39 }
 0x31a   :  { %v866_v41 = vmul.f32 1.442695, %v865_v40 }
 0x31c   :  { %1152 = vpow2.f32 %v866_v41 }
 0x326   :  { %v1153_v42 = vpop.eup %1152 }
 0x327   :  { %868 = vadd.xlane.f32.xlu0 %v1153_v42 }
 0x3b4   :  { %v869_v43 = vpop.xlane.xlu0 %868 }
 0x3b5   :  { %1154 = vlog2.f32 %v869_v43 }
 0x3bf   :  { %v1155_v44 = vpop.eup %1154 }
 0x3c0   :  { %v871_v45 = vmul.f32 0.6931472, %v1155_v44 }
 0x3c2   :  { %v872_v46 = vsub.f32 %v865_v40, %v871_v45 }
 0x3c4   :  { %873 = vst [vmem:[#allocation5] sm:$0xff] %v872_v46 }
 0x3c5   :  { %1233 = shalt.err (!%p1230_p0)  }
 0x3c6   :  { %s1234_s23 = scalar_lea.hbm %s1387_s7, 128 }
 0x3c7   :  { %p1235_p1 = scmp.ne.s32.totalorder %s1387_s7, %s1234_s23  ;;  %p1238_p2 = scmp.lt.u32.totalorder %s1234_s23, %s1387_s7 }
 0x3c9   :  { %p1240_p3 = pnand %p1238_p2, %p1235_p1 }
 0x3cb   :  { %1243 = shalt.err (!%p1240_p3)  }
 0x3cc   :  { %884 = dma.vmem_to_hbm [thread:$0]  %s882_s19, 128, %s1387_s7, [#allocation6] }
 0x3cd   :  { %1248 = dma.done.wait [#allocation6], 128 }
 0x3ce   :  { %1249 = vsyncadd [#allocation6], 4294967168 }
 0x3cf   :  { %888 = vsyncpa [#allocation8], 1 }
 0x3d0   :  { %889 = vsyncpa [#allocation10], 1 }
 0x3d1   :  { %890 = vsyncmov [#allocation6] }
 0x3d4   :  { %s891_s29 = vpop.sfrf %890 }
 0x3d5   :  { %p970_p4 = scmp.ne.s32.totalorder %s891_s29, 0 }
 0x3d7   :  { %895 = shalt.err (%p970_p4)  }
 0x3d8   :  { %897 = vsyncmov [#allocation6 + $0x1] }
 0x3db   :  { %s898_s30 = vpop.sfrf %897 }
 0x3dc   :  { %p971_p5 = scmp.ne.s32.totalorder %s898_s30, 0 }
 0x3de   :  { %902 = shalt.err (%p971_p5)  }

</bundles_post_ra>
